<compile_context>
chip_gen: v7x
topology: tpu7x:2x2x1
jax: 0.10.0
libtpu: 0.0.40
codegen_flags: <defaults>
</compile_context>

<pallas_src>
import jax
import jax.numpy as jnp
from jax.experimental import pallas as pl
from jax.experimental.pallas import tpu as pltpu

_LANE = 128
_SUBLANE = 8


def classify_kernel(x_ref, w_ref, o_ref, acc_ref):
    # x_ref: (TB, C1, chunk)  w_ref: (C1, C2p)  o_ref: (TB, C2p)  acc_ref: (TB, C1) f32
    k = pl.program_id(1)

    @pl.when(k == 0)
    def _init():
        acc_ref[...] = jnp.zeros_like(acc_ref)

    # Per-chunk partial spatial sum, accumulated in f32 across grid steps.
    acc_ref[...] += jnp.sum(x_ref[...].astype(jnp.float32), axis=-1)

    @pl.when(k == pl.num_programs(1) - 1)
    def _finalize():
        # 1/(H*W) is already folded into w; cast the (tiny) pooled tensor to the
        # weight dtype so bf16 weights feed the MXU in bf16 with f32 accumulation.
        pooled = acc_ref[...].astype(w_ref.dtype)                    # (TB, C1)
        out = jnp.dot(pooled, w_ref[...], preferred_element_type=jnp.float32)
        o_ref[...] = out.astype(o_ref.dtype)


def _round_up(n, m):
    return -(-n // m) * m


def classify_forward(x, conv_weight):
    """x: (B, C1, H, W) NCHW; conv_weight: (C2, C1, 1, 1) like PyTorch Conv2d."""
    B, C1, H, W = x.shape
    # TODO(synk): only the module defaults (k=1, s=1, groups=1, bias=False) are
    # implemented; non-default configs fail loudly instead of computing wrong.
    if conv_weight.ndim != 4 or conv_weight.shape[2:] != (1, 1):
        raise NotImplementedError("Classify Pallas kernel only supports k=1, s=1 conv.")
    if conv_weight.shape[1] != C1:
        raise NotImplementedError("Classify Pallas kernel only supports groups=1.")
    C2 = conv_weight.shape[0]
    HW = H * W

    # Spatial tiling: chunk is a multiple of 128 lanes (prefer 512).
    hw_pad = _round_up(HW, _LANE)
    chunk = _LANE
    for cand in (512, 256, 128):
        if hw_pad % cand == 0:
            chunk = cand
            break

    # Batch tiling (parallel axis for megacore).
    TB = min(B, _SUBLANE)
    b_pad = _round_up(B, TB)

    # Lane-dense output: pad C2 up to a multiple of 128 (sliced off afterwards).
    C2p = _round_up(C2, _LANE)

    # Reshape / pad activations (zero padding does not perturb the spatial sum).
    x_flat = x.reshape(B, C1, HW)
    if hw_pad != HW or b_pad != B:
        x_flat = jnp.pad(x_flat, ((0, b_pad - B), (0, 0), (0, hw_pad - HW)))

    # Weight: (C2, C1, 1, 1) -> (C1, C2p), with the 1/(H*W) mean scale folded in.
    w_t = conv_weight.reshape(C2, C1).T.astype(jnp.float32) * (1.0 / HW)
    w_t = w_t.astype(conv_weight.dtype)
    if C2p != C2:
        w_t = jnp.pad(w_t, ((0, 0), (0, C2p - C2)))

    grid = (b_pad // TB, hw_pad // chunk)

    itemsize = jnp.dtype(x.dtype).itemsize
    w_itemsize = jnp.dtype(w_t.dtype).itemsize
    x_block_bytes = TB * C1 * chunk * itemsize
    w_bytes = C1 * C2p * w_itemsize
    o_block_bytes = TB * C2p * itemsize
    vmem_need = 2 * (x_block_bytes + w_bytes + o_block_bytes) + TB * C1 * 4 + (2 << 20)
    vmem_limit = int(min(64 << 20, max(16 << 20, vmem_need)))

    cost = pl.CostEstimate(
        flops=int(B * C1 * HW + 2 * B * C1 * C2),
        transcendentals=0,
        bytes_accessed=int(B * C1 * HW * itemsize + C1 * C2p * w_itemsize
                           + B * C2 * itemsize),
    )

    out_padded = pl.pallas_call(
        classify_kernel,
        out_shape=jax.ShapeDtypeStruct((b_pad, C2p), x.dtype),
        grid_spec=pltpu.PrefetchScalarGridSpec(
            num_scalar_prefetch=0,
            grid=grid,
            in_specs=[
                pl.BlockSpec((TB, C1, chunk), lambda b, k: (b, 0, k)),
                pl.BlockSpec((C1, C2p), lambda b, k: (0, 0)),
            ],
            out_specs=pl.BlockSpec((TB, C2p), lambda b, k: (b, 0)),
            scratch_shapes=[pltpu.VMEM((TB, C1), jnp.float32)],
        ),
        compiler_params=pltpu.CompilerParams(
            dimension_semantics=("parallel", "arbitrary"),
            vmem_limit_bytes=vmem_limit,
        ),
        cost_estimate=cost,
    )(x_flat, w_t)

    return out_padded[:B, :C2]


if __name__ == "__main__":
    key = jax.random.PRNGKey(0)
    kx, kw = jax.random.split(key)

    B, C1, C2, H, W = 2, 4, 8, 16, 16
    x = jax.random.normal(kx, (B, C1, H, W), dtype=jnp.float32)
    # Deterministic conv weight, shape (c2, c1, k, k) with k=1, bias=False.
    conv_weight = jax.random.normal(kw, (C2, C1, 1, 1), dtype=jnp.float32) * 0.1

    out = classify_forward(x, conv_weight)
    out = jax.block_until_ready(out)

    # Reference check in plain JAX (same math as the PyTorch module).
    pooled_ref = jnp.mean(x, axis=(2, 3))                       # (B, C1)
    ref = pooled_ref @ conv_weight.reshape(C2, C1).T            # (B, C2)
    assert out.shape == (B, C2)
    assert jnp.allclose(out, ref, atol=1e-5, rtol=1e-5), float(jnp.max(jnp.abs(out - ref)))

    print("KERNEL_OK")
</pallas_src>

<mosaic_0001>
module attributes {stable_mosaic.version = 11 : i64} {
  func.func @classify_kernel(%arg0: i32, %arg1: i32, %arg2: memref<2x4x256xf32, #tpu.memory_space<vmem>>, %arg3: memref<4x128xf32, #tpu.memory_space<vmem>>, %arg4: memref<2x128xf32, #tpu.memory_space<vmem>>, %arg5: memref<2x4xf32, #tpu.memory_space<vmem>>) attributes {dimension_semantics = [#tpu.dimension_semantics<parallel>, #tpu.dimension_semantics<arbitrary>], iteration_bounds = array<i64: 1, 1>, scalar_prefetch = 0 : i64, scratch_operands = 1 : i64, tpu.core_type = #tpu.core_type<tc>, window_params = [{transform_indices = @transform_0, window_bounds = array<i64: 2, 4, 256>}, {pipeline_mode = #tpu.pipeline_mode<synchronous>, transform_indices = @transform_1, window_bounds = array<i64: 4, 128>}, {transform_indices = @transform_2, window_bounds = array<i64: 2, 128>}]} {
    %c0_i32 = arith.constant 0 : i32
    %0 = arith.cmpi eq, %arg1, %c0_i32 : i32
    %1 = arith.extui %0 : i1 to i32
    %c0_i32_0 = arith.constant 0 : i32
    %2 = arith.cmpi ne, %1, %c0_i32_0 : i32
    scf.if %2 {
      %cst_9 = arith.constant 0.000000e+00 : f32
      %11 = vector.broadcast %cst_9 : f32 to vector<2x4xf32>
      %c0_10 = arith.constant 0 : index
      %c0_11 = arith.constant 0 : index
      %12 = vector.load %arg5[%c0_10, %c0_11] : memref<2x4xf32, #tpu.memory_space<vmem>>, vector<2x4xf32>
      tpu.vector_store %arg5[%c0_10, %c0_11], %11 {strides = array<i32>} : memref<2x4xf32, #tpu.memory_space<vmem>>, vector<2x4xf32>,
    } else {
    }
    %c0 = arith.constant 0 : index
    %c0_1 = arith.constant 0 : index
    %3 = vector.load %arg5[%c0, %c0_1] : memref<2x4xf32, #tpu.memory_space<vmem>>, vector<2x4xf32>
    %c0_2 = arith.constant 0 : index
    %c0_3 = arith.constant 0 : index
    %c0_4 = arith.constant 0 : index
    %4 = vector.load %arg2[%c0_2, %c0_3, %c0_4] : memref<2x4x256xf32, #tpu.memory_space<vmem>>, vector<2x4x256xf32>
    %cst = arith.constant dense<0.000000e+00> : vector<2x4xf32>
    %5 = vector.multi_reduction <add>, %4, %cst [2] : vector<2x4x256xf32> to vector<2x4xf32>
    %6 = arith.addf %3, %5 : vector<2x4xf32>
    %c0_5 = arith.constant 0 : index
    %c0_6 = arith.constant 0 : index
    %7 = vector.load %arg5[%c0_5, %c0_6] : memref<2x4xf32, #tpu.memory_space<vmem>>, vector<2x4xf32>
    tpu.vector_store %arg5[%c0_5, %c0_6], %6 {strides = array<i32>} : memref<2x4xf32, #tpu.memory_space<vmem>>, vector<2x4xf32>,
    %c0_i32_7 = arith.constant 0 : i32
    %8 = arith.cmpi eq, %arg1, %c0_i32_7 : i32
    %9 = arith.extui %8 : i1 to i32
    %c0_i32_8 = arith.constant 0 : i32
    %10 = arith.cmpi ne, %9, %c0_i32_8 : i32
    scf.if %10 {
      %c0_9 = arith.constant 0 : index
      %c0_10 = arith.constant 0 : index
      %11 = vector.load %arg5[%c0_9, %c0_10] : memref<2x4xf32, #tpu.memory_space<vmem>>, vector<2x4xf32>
      %c0_11 = arith.constant 0 : index
      %c0_12 = arith.constant 0 : index
      %12 = vector.load %arg3[%c0_11, %c0_12] : memref<4x128xf32, #tpu.memory_space<vmem>>, vector<4x128xf32>
      %cst_13 = arith.constant dense<0.000000e+00> : vector<2x128xf32>
      %13 = tpu.matmul %11, %12, %cst_13 {dimension_numbers = #tpu.dot_dimension_numbers<[1], [0], [0], [1], [0, 0, 1, 1], [], []>} : vector<2x4xf32>, vector<4x128xf32>, vector<2x128xf32> -> vector<2x128xf32>
      %c0_14 = arith.constant 0 : index
      %c0_15 = arith.constant 0 : index
      %14 = vector.load %arg4[%c0_14, %c0_15] : memref<2x128xf32, #tpu.memory_space<vmem>>, vector<2x128xf32>
      tpu.vector_store %arg4[%c0_14, %c0_15], %13 {strides = array<i32>} : memref<2x128xf32, #tpu.memory_space<vmem>>, vector<2x128xf32>,
    } else {
    }
    return
  }
  func.func @transform_0(%arg0: i32, %arg1: i32) -> (i32, i32, i32) {
    %c0_i32 = arith.constant 0 : i32
    %c0_i32_0 = arith.constant 0 : i32
    return %arg0, %c0_i32, %arg1 : i32, i32, i32
  }
  func.func @transform_1(%arg0: i32, %arg1: i32) -> (i32, i32) {
    %c0_i32 = arith.constant 0 : i32
    %c0_i32_0 = arith.constant 0 : i32
    %c0_i32_1 = arith.constant 0 : i32
    return %c0_i32, %c0_i32_0 : i32, i32
  }
  func.func @transform_2(%arg0: i32, %arg1: i32) -> (i32, i32) {
    %c0_i32 = arith.constant 0 : i32
    %c0_i32_0 = arith.constant 0 : i32
    return %arg0, %c0_i32 : i32, i32
  }
}

</mosaic_0001>

<bundles_post_ra>
// kernel: tpu_custom_call.1
= control target key start
LH: loop header
LB: loop body
LE: loop exit
PB: predicated region body
PF: predicated region fallthrough
CT: control target
= control target key end

     0   :  { %7 = vsyncpa [#allocation4], 0  ;;  %s336_s0 = inlined_call_operand.hbm [shape: f32[2,4,256], index: 0, kind: input, shape index: {}]   ;;  %s337_s1 = inlined_call_operand.hbm [shape: f32[4,128], index: 1, kind: input, shape index: {}]   ;;  %s338_s2 = inlined_call_operand.hbm [shape: f32[2,128], index: 2, kind: output, shape index: {}]  }
   0x1   :  { %8 = vsyncpa [#allocation7], 0 }
   0x2   :  { %9 = vsyncpa [#allocation5], 0  ;;  %s271_s9 = smov [#allocation3]   ;;  %s199_s13 = scalar_lea.hbm %s336_s0, 256 }
   0x3   :  { %s15_s10 = sshll.u32 %s271_s9, 4  ;;  %p200_p0 = scmp.ne.s32.totalorder %s336_s0, %s199_s13  ;;  %s16_s10 = int_to_ptr.vmem [resolvable:$true] %s15_s10 }
   0x4   :  { %p203_p1 = scmp.lt.u32.totalorder %s199_s13, %s336_s0 }
   0x6   :  { %p205_p2 = pnand %p203_p1, %p200_p0 }
   0x8   :  { %208 = shalt.err (!%p205_p2)
}
   0x9   :  { %s209_s18 = scalar_lea.vmem %s16_s10, 256  ;;  %p214_p4 = scmp.lt.s32.totalorder %s16_s10, %s16_s10 }
   0xa   :  { %p210_p3 = scmp.ne.s32.totalorder %s16_s10, %s209_s18  ;;  %p215_p5 = scmp.lt.s32.totalorder %s209_s18, %s209_s18 }
   0xc   :  { %p216_p6 = por %p215_p5, %p214_p4 }
   0xe   :  { %p217_p7 = pnand %p216_p6, %p210_p3 }
  0x10   :  { %220 = shalt.err (!%p217_p7)
}
  0x11   :  { %s272_s19 = smov 128   ;;  %s273_s20 = smov 8  }
  0x12   :  { %21 = dma.hbm_to_vmem [thread:$0]  %s336_s0, 256, %s16_s10, [#allocation4], %s272_s19, %s272_s19, %s273_s20  }
  0x13   :  { %s274_s23 = smov [#allocation6]   ;;  %s221_s27 = scalar_lea.hbm %s337_s1, 64 }
  0x14   :  { %s28_s24 = sshll.u32 %s274_s23, 4  ;;  %p222_p8 = scmp.ne.s32.totalorder %s337_s1, %s221_s27  ;;  %s29_s24 = int_to_ptr.vmem [resolvable:$true] %s28_s24 }
  0x15   :  { %p225_p9 = scmp.lt.u32.totalorder %s221_s27, %s337_s1 }
  0x17   :  { %p227_p10 = pnand %p225_p9, %p222_p8 }
  0x19   :  { %230 = shalt.err (!%p227_p10)
}
  0x1a   :  { %s231_s4 = scalar_lea.vmem %s29_s24, 64  ;;  %p236_p12 = scmp.lt.s32.totalorder %s29_s24, %s29_s24 }
  0x1b   :  { %p232_p11 = scmp.ne.s32.totalorder %s29_s24, %s231_s4  ;;  %p237_p13 = scmp.lt.s32.totalorder %s231_s4, %s231_s4 }
  0x1d   :  { %p238_p0 = por %p237_p13, %p236_p12 }
  0x1f   :  { %p239_p1 = pnand %p238_p0, %p232_p11 }
  0x21   :  { %242 = shalt.err (!%p239_p1)
}
  0x22   :  { %31 = dma.hbm_to_vmem [thread:$0]  %s337_s1, 64, %s29_s24, [#allocation7]  }
  0x23   :  { %265 = dma.done.wait [#allocation4], 256  }
  0x24   :  { %266 = vsyncadd [#allocation4], 4294967040 }
  0x25   :  { %267 = dma.done.wait [#allocation7], 64  }
  0x26   :  { %268 = vsyncadd [#allocation7], 4294967232  ;;  %vm53_vm0 = vcmask 1043456   ;;  %v45_v0 = vld [vmem:[#allocation3] sm:$0xff]  ;;  %v46_v1 = vld [vmem:[#allocation3 + $0x8] sm:$0xff]  ;;  %vm42_vm1 = vcmask 25600   ;;  %v66_v12 = vlaneseq }
  0x27   :  { %v49_v2 = vcombine.high %v45_v0, %v45_v0  ;;  %v54_v3 = vsel %vm53_vm0, %v45_v0, 0.0  ;;  %v50_v4 = vcombine.high %v46_v1, %v46_v1  ;;  %v59_v6 = vsel %vm53_vm0, %v46_v1, 0.0  ;;  %v86_v11 = vld [vmem:[#allocation6] sm:$0xf]  ;;  %s277_s1 = smov [#allocation8]  }
  0x28   :  { %v275_v10 = vmov 0.0   ;;  %vm276_vm2 = vmmov 0   ;;  %v67_v13 = vand.u32 127, %v66_v12  ;;  %v69_v14 = vshrl.u32 %v66_v12, 7  ;;  %s171_s6 = sshll.u32 %s277_s1, 4  ;;  %s172_s6 = int_to_ptr.vmem [resolvable:$true] %s171_s6 }
  0x29   :  { %v55_v5 = vsel %vm53_vm0, %v49_v2, 0.0  ;;  %v60_v7 = vsel %vm53_vm0, %v50_v4, 0.0  ;;  %43 = vst.msk [vmem:[#allocation2] sm:$0x3] %vm42_vm1, %v275_v10  ;;  %185 = vmatprep.subr.mxu0 %v275_v10  ;;  %187 = vmatprep.mubr.msk.f32.mxu0 %vm276_vm2, %v275_v10  ;;  %vm76_vm3 = vcmask 1041409   ;;  %vm87_vm4 = vcmask 31744   ;;  %p248_p3 = scmp.lt.s32.totalorder %s172_s6, %s172_s6 }
  0x2a   :  { %v56_v8 = vadd.f32 %v55_v5, %v54_v3  ;;  %v61_v9 = vadd.f32 %v60_v7, %v59_v6  ;;  %186 = vmatpush3.msk.msra.mxu0 %vm53_vm0, %v86_v11  ;;  %v70_v16 = vsub.s32 %v67_v13, %v69_v14  ;;  %s243_s7 = scalar_lea.vmem %s172_s6, 32 }
  0x2b   :  { %p244_p2 = scmp.ne.s32.totalorder %s172_s6, %s243_s7  ;;  %p249_p4 = scmp.lt.s32.totalorder %s243_s7, %s243_s7 }
  0x2c   :  { %57 = vadd.xlane.f32.xlu0 %v56_v8 }
  0x2d   :  { %p250_p5 = por %p249_p4, %p248_p3 }
  0x2f   :  { %p251_p6 = pnand %p250_p5, %p244_p2 }
  0x30   :  { %62 = vadd.xlane.f32.xlu0 %v61_v9  ;;  %v44_v20 = vld [vmem:[#allocation2] sm:$0x3] }
  0xb9   :  { %v58_v15 = vpop.xlane.xlu0 %57 }
  0xba   :  { %v71_v18 = vrot.slane %v58_v15, %v70_v16 }
  0xbd   :  { %v63_v17 = vpop.xlane.xlu0 %62 }
  0xbe   :  { %v75_v19 = vrot.slane %v63_v17, %v70_v16 }
  0xc0   :  { %v77_v21 = vsel %vm76_vm3, %v75_v19, %v71_v18 }
  0xc1   :  { %v79_v22 = vadd.f32 %v77_v21, %v44_v20 }
  0xc3   :  { %81 = vst.msk [vmem:[#allocation2] sm:$0x3] %vm42_vm1, %v79_v22 }
  0xca   :  { %v85_v23 = vld [vmem:[#allocation2] sm:$0x3] }
  0xcb   :  { %188 = vmatmul.mubr.msk.f32.vlgmr.msra.gmra.mrb[0].mxu0 %vm87_vm4, %v85_v23 }
 0x19e   :  { %v160_v24 = vpop.f32.mrb[0].mxu0 }
 0x19f   :  { %164 = vst [vmem:[#allocation8] sm:$0x3] %v160_v24  ;;  %v189_v25 = vpop.f32.mrb[1].mxu0 }
 0x1a0   :  { %254 = shalt.err (!%p251_p6)
}
 0x1a1   :  { %s255_s10 = scalar_lea.hbm %s338_s2, 32 }
 0x1a2   :  { %p256_p7 = scmp.ne.s32.totalorder %s338_s2, %s255_s10  ;;  %p259_p8 = scmp.lt.u32.totalorder %s255_s10, %s338_s2 }
 0x1a4   :  { %p261_p9 = pnand %p259_p8, %p256_p7 }
 0x1a6   :  { %264 = shalt.err (!%p261_p9)
}
 0x1a7   :  { %174 = dma.vmem_to_hbm [thread:$0]  %s172_s6, 32, %s338_s2, [#allocation5]  }
 0x1a8   :  { %269 = dma.done.wait [#allocation5], 32  }
 0x1a9   :  { %270 = vsyncadd [#allocation5], 4294967264 }
 0x1aa   :  { %178 = vsyncpa [#allocation4], 1 }
 0x1ab   :  { %179 = vsyncpa [#allocation7], 1 }
 0x1ac   :  { %180 = vsyncpa [#allocation5], 1 }

</bundles_post_ra>
